<compile_context>
chip_gen: v5e
topology: v5e:2x2
jax: 0.10.0
libtpu: 0.0.40
codegen_flags: <defaults>
</compile_context>

<pallas_src>
import jax
import jax.numpy as jnp
from jax.experimental import pallas as pl
from jax.experimental.pallas import tpu as pltpu

jax.config.update("jax_default_matmul_precision", "highest")

EPS_GEN = 1e-7   # GENConv message epsilon
EPS_BN = 1e-5    # BatchNorm1d epsilon


def _round_up(v, m):
    return ((v + m - 1) // m) * m


def _pad2(a, rows, cols):
    return jnp.pad(a, ((0, rows - a.shape[0]), (0, cols - a.shape[1])))


# --------------------------------------------------------------------------
# Stage 1: fused src|dst projection + softmax message terms (computed once).
# --------------------------------------------------------------------------
def proj_kernel(x_ref, w_ref, b_ref, p_ref, pm_ref, xdst_ref):
    cp = p_ref.shape[1]
    proj = jnp.dot(x_ref[...], w_ref[...],
                   preferred_element_type=jnp.float32) + b_ref[...]     # [N, 2*CP]
    xdst_ref[...] = proj[:, cp:]                                        # lin_dst(x)
    msg = jnp.maximum(proj[:, :cp], 0.0) + jnp.float32(EPS_GEN)         # relu(x_src)+eps
    # Softmax is shift-invariant per feature: a global per-feature max keeps
    # every exp argument <= 0 (numerically safe) and lets the aggregation be
    # expressed as two plain matmuls against the adjacency mask.
    mx = jnp.max(msg, axis=0, keepdims=True)                            # [1, CP]
    p = jnp.exp(msg - mx)                                               # [N, CP]
    p_ref[...] = p.astype(jnp.bfloat16)
    pm_ref[...] = (p * msg).astype(jnp.bfloat16)


# --------------------------------------------------------------------------
# Stage 2: softmax aggregation (2 MXU matmuls) + residual + MLP + head,
# tiled over destination nodes.
# --------------------------------------------------------------------------
def conv_kernel(adj_ref, p_ref, pm_ref, xdst_ref,
                w_m1_ref, b_m1_ref, w_m2_ref, b_m2_ref,
                w_l1_ref, b_l1_ref, w_l2_ref, b_l2_ref,
                out_ref):
    adj = adj_ref[...]                                                  # [T, N] bf16 (0/1)
    num = jnp.dot(adj, pm_ref[...], preferred_element_type=jnp.float32)  # [T, CP]
    den = jnp.dot(adj, p_ref[...], preferred_element_type=jnp.float32)   # [T, CP]
    aggr = num / jnp.maximum(den, jnp.float32(1e-16))                   # 0 for isolated nodes

    h = aggr + xdst_ref[...]                                            # GENConv residual

    # GENConv MLP: Linear (BN pre-folded into w/b) -> ReLU -> Linear
    h1 = jnp.maximum(
        jnp.dot(h, w_m1_ref[...], preferred_element_type=jnp.float32) + b_m1_ref[...], 0.0)
    h2 = jnp.dot(h1, w_m2_ref[...], preferred_element_type=jnp.float32) + b_m2_ref[...]

    # head: dropout(eval)=identity, relu, linear1, relu, linear2, relu
    h2 = jnp.maximum(h2, 0.0)
    h3 = jnp.maximum(
        jnp.dot(h2, w_l1_ref[...], preferred_element_type=jnp.float32) + b_l1_ref[...], 0.0)
    h4 = jnp.dot(h3, w_l2_ref[...], preferred_element_type=jnp.float32) + b_l2_ref[...]
    out_ref[...] = jnp.maximum(h4, 0.0)


def rna_genconv_forward(x, adj, params, *, tile_n=128):
    n, f_in = x.shape
    c = params["w_src"].shape[1]
    hidden = params["w_mlp1"].shape[1]
    mid = params["w_l1"].shape[1]
    out_dim = params["w_l2"].shape[1]

    # lane-dense padded dims
    fp = _round_up(f_in, 128)
    cp = _round_up(c, 128)
    hp = _round_up(hidden, 128)
    lp = _round_up(mid, 128)
    op = _round_up(out_dim, 128)

    # destination-node tile (multiple of 16 for bf16 sublane packing)
    tile_n = int(max(16, _round_up(tile_n, 16)))
    np_ = _round_up(n, tile_n)

    # --- fold eval-mode BatchNorm1d into the first MLP linear ---
    scale = params["bn_g"] / jnp.sqrt(params["bn_v"] + EPS_BN)          # [1, hidden]
    w_m1 = params["w_mlp1"] * scale
    b_m1 = (params["b_mlp1"] - params["bn_m"]) * scale + params["bn_b"]

    # --- concatenated src|dst projection + zero-padded weights ---
    w_proj = jnp.concatenate([_pad2(params["w_src"], fp, cp),
                              _pad2(params["w_dst"], fp, cp)], axis=1)  # [fp, 2cp]
    b_proj = jnp.concatenate([_pad2(params["b_src"], 1, cp),
                              _pad2(params["b_dst"], 1, cp)], axis=1)   # [1, 2cp]
    w_m1p, b_m1p = _pad2(w_m1, cp, hp), _pad2(b_m1, 1, hp)
    w_m2p, b_m2p = _pad2(params["w_mlp2"], hp, cp), _pad2(params["b_mlp2"], 1, cp)
    w_l1p, b_l1p = _pad2(params["w_l1"], cp, lp), _pad2(params["b_l1"], 1, lp)
    w_l2p, b_l2p = _pad2(params["w_l2"], lp, op), _pad2(params["b_l2"], 1, op)

    x_p = _pad2(x.astype(jnp.float32), np_, fp)
    adj_p = _pad2(adj.astype(jnp.float32), np_, np_).astype(jnp.bfloat16)  # 0/1 exact in bf16

    vmem = pl.BlockSpec(memory_space=pltpu.MemorySpace.VMEM)

    # ---- Stage 1: projections + softmax terms (once, whole graph) ----
    p_bf, pm_bf, x_dst = pl.pallas_call(
        proj_kernel,
        out_shape=(jax.ShapeDtypeStruct((np_, cp), jnp.bfloat16),
                   jax.ShapeDtypeStruct((np_, cp), jnp.bfloat16),
                   jax.ShapeDtypeStruct((np_, cp), jnp.float32)),
        in_specs=[vmem, vmem, vmem],
        out_specs=(vmem, vmem, vmem),
    )(x_p, w_proj, b_proj)

    # ---- Stage 2: aggregation + MLP + head, gridded over destination tiles ----
    def full(r, ccols):
        return pl.BlockSpec((r, ccols), lambda i: (0, 0))

    out = pl.pallas_call(
        conv_kernel,
        out_shape=jax.ShapeDtypeStruct((np_, op), jnp.float32),
        grid_spec=pltpu.PrefetchScalarGridSpec(
            num_scalar_prefetch=0,
            grid=(np_ // tile_n,),
            in_specs=[pl.BlockSpec((tile_n, np_), lambda i: (i, 0)),   # adj tile (dominant DMA)
                      full(np_, cp),                                   # p
                      full(np_, cp),                                   # p*msg
                      pl.BlockSpec((tile_n, cp), lambda i: (i, 0)),    # x_dst tile
                      full(cp, hp), full(1, hp),
                      full(hp, cp), full(1, cp),
                      full(cp, lp), full(1, lp),
                      full(lp, op), full(1, op)],
            out_specs=pl.BlockSpec((tile_n, op), lambda i: (i, 0)),
        ),
        compiler_params=pltpu.CompilerParams(
            dimension_semantics=("parallel",),
            vmem_limit_bytes=32 * 1024 * 1024),
    )(adj_p, p_bf, pm_bf, x_dst,
      w_m1p, b_m1p, w_m2p, b_m2p, w_l1p, b_l1p, w_l2p, b_l2p)

    return out[:n, :out_dim]


# --------------------------------------------------------------------------
# Parameters / pure-JAX reference (for the self-check)
# --------------------------------------------------------------------------
def init_params(key, f_in, c, out_dim):
    def linear(k, din, dout):
        s = 1.0 / (din ** 0.5)
        kw, kb = jax.random.split(k)
        w = jax.random.uniform(kw, (din, dout), jnp.float32, -s, s)
        b = jax.random.uniform(kb, (1, dout), jnp.float32, -s, s)
        return w, b

    ks = jax.random.split(key, 6)
    w_src, b_src = linear(ks[0], f_in, c)
    w_dst, b_dst = linear(ks[1], f_in, c)
    w_mlp1, b_mlp1 = linear(ks[2], c, 2 * c)
    w_mlp2, b_mlp2 = linear(ks[3], 2 * c, c)
    w_l1, b_l1 = linear(ks[4], c, c + 5)
    w_l2, b_l2 = linear(ks[5], c + 5, out_dim)
    return {
        "w_src": w_src, "b_src": b_src,
        "w_dst": w_dst, "b_dst": b_dst,
        "w_mlp1": w_mlp1, "b_mlp1": b_mlp1,
        "bn_g": jnp.ones((1, 2 * c), jnp.float32),
        "bn_b": jnp.zeros((1, 2 * c), jnp.float32),
        "bn_m": jnp.zeros((1, 2 * c), jnp.float32),
        "bn_v": jnp.ones((1, 2 * c), jnp.float32),
        "w_mlp2": w_mlp2, "b_mlp2": b_mlp2,
        "w_l1": w_l1, "b_l1": b_l1,
        "w_l2": w_l2, "b_l2": b_l2,
    }


def reference_forward(x, adj, params):
    x_src = x @ params["w_src"] + params["b_src"]
    x_dst = x @ params["w_dst"] + params["b_dst"]
    msg = jnp.maximum(x_src, 0.0) + EPS_GEN                 # [N, C]
    mask = adj[:, :, None] > 0                              # [N, N, 1]
    logits = jnp.where(mask, msg[None, :, :], -jnp.inf)
    mx = jnp.max(logits, axis=1, keepdims=True)
    mx = jnp.where(jnp.isfinite(mx), mx, 0.0)
    e = jnp.where(mask, jnp.exp(logits - mx), 0.0)
    den = jnp.maximum(e.sum(axis=1, keepdims=True), 1e-16)
    aggr = jnp.sum(e / den * msg[None, :, :], axis=1)
    h = aggr + x_dst
    scale = params["bn_g"] / jnp.sqrt(params["bn_v"] + EPS_BN)
    h1 = jnp.maximum(
        (h @ params["w_mlp1"] + params["b_mlp1"] - params["bn_m"]) * scale + params["bn_b"], 0.0)
    h2 = jnp.maximum(h1 @ params["w_mlp2"] + params["b_mlp2"], 0.0)
    h3 = jnp.maximum(h2 @ params["w_l1"] + params["b_l1"], 0.0)
    return jnp.maximum(h3 @ params["w_l2"] + params["b_l2"], 0.0)


if __name__ == "__main__":
    # Small synthetic RNA-like chain graph (exercises node padding + 2 grid tiles).
    N = 24           # number of nodes
    F_IN = 8         # node_features_dim
    C = 32           # node_embedding_dim
    OUT = 5          # node_output_features_dim

    key = jax.random.PRNGKey(0)
    kx, kp = jax.random.split(key)

    x = jax.random.normal(kx, (N, F_IN), jnp.float32)

    # edge_index: bidirectional chain 0-1-...-(N-1) (PyG convention [2, E])
    src = jnp.concatenate([jnp.arange(N - 1), jnp.arange(1, N)])
    dst = jnp.concatenate([jnp.arange(1, N), jnp.arange(N - 1)])
    edge_index = jnp.stack([src, dst]).astype(jnp.int32)

    # dense adjacency mask: adj[i, j] = 1 iff edge j -> i (glue, plain JAX)
    adj = jnp.zeros((N, N), jnp.float32).at[edge_index[1], edge_index[0]].set(1.0)

    params = init_params(kp, F_IN, C, OUT)

    out = rna_genconv_forward(x, adj, params, tile_n=16)
    out = jax.block_until_ready(out)
    assert out.shape == (N, OUT) and out.dtype == jnp.float32

    ref = reference_forward(x, adj, params)
    tol = 5e-2 * (1.0 + float(jnp.max(jnp.abs(ref))))       # bf16 aggregation operands
    err = float(jnp.max(jnp.abs(out - ref)))
    assert err <= tol, f"mismatch vs reference: max abs err {err} > {tol}"
    print("KERNEL_OK")
</pallas_src>

<mosaic_0001>
module attributes {stable_mosaic.version = 11 : i64} {
  func.func @proj_kernel(%arg0: memref<32x128xf32, #tpu.memory_space<vmem>>, %arg1: memref<128x256xf32, #tpu.memory_space<vmem>>, %arg2: memref<1x256xf32, #tpu.memory_space<vmem>>, %arg3: memref<32x128xbf16, #tpu.memory_space<vmem>>, %arg4: memref<32x128xbf16, #tpu.memory_space<vmem>>, %arg5: memref<32x128xf32, #tpu.memory_space<vmem>>) attributes {dimension_semantics = [], scalar_prefetch = 0 : i64, scratch_operands = 0 : i64, tpu.core_type = #tpu.core_type<tc>} {
    %c0 = arith.constant 0 : index
    %c0_0 = arith.constant 0 : index
    %0 = vector.load %arg0[%c0, %c0_0] : memref<32x128xf32, #tpu.memory_space<vmem>>, vector<32x128xf32>
    %c0_1 = arith.constant 0 : index
    %c0_2 = arith.constant 0 : index
    %1 = vector.load %arg1[%c0_1, %c0_2] : memref<128x256xf32, #tpu.memory_space<vmem>>, vector<128x256xf32>
    %cst = arith.constant dense<0.000000e+00> : vector<32x256xf32>
    %2 = tpu.matmul %0, %1, %cst {dimension_numbers = #tpu.dot_dimension_numbers<[1], [0], [0], [1], [0, 0, 1, 1], [], []>, precision = #tpu.contract_precision<fp32>} : vector<32x128xf32>, vector<128x256xf32>, vector<32x256xf32> -> vector<32x256xf32>
    %c0_3 = arith.constant 0 : index
    %c0_4 = arith.constant 0 : index
    %3 = vector.load %arg2[%c0_3, %c0_4] : memref<1x256xf32, #tpu.memory_space<vmem>>, vector<1x256xf32>
    %4 = vector.broadcast %3 : vector<1x256xf32> to vector<32x256xf32>
    %5 = arith.addf %2, %4 : vector<32x256xf32>
    %6 = vector.extract_strided_slice %5 {offsets = [0, 128], sizes = [32, 128], strides = [1, 1]} : vector<32x256xf32> to vector<32x128xf32>
    %c0_5 = arith.constant 0 : index
    %c0_6 = arith.constant 0 : index
    %7 = vector.load %arg5[%c0_5, %c0_6] : memref<32x128xf32, #tpu.memory_space<vmem>>, vector<32x128xf32>
    tpu.vector_store %arg5[%c0_5, %c0_6], %6 {strides = array<i32>} : memref<32x128xf32, #tpu.memory_space<vmem>>, vector<32x128xf32>,
    %8 = vector.extract_strided_slice %5 {offsets = [0, 0], sizes = [32, 128], strides = [1, 1]} : vector<32x256xf32> to vector<32x128xf32>
    %cst_7 = arith.constant 0.000000e+00 : f32
    %9 = vector.broadcast %cst_7 : f32 to vector<32x128xf32>
    %10 = arith.maximumf %8, %9 : vector<32x128xf32>
    %cst_8 = arith.constant 1.000000e-07 : f32
    %11 = vector.broadcast %cst_8 : f32 to vector<32x128xf32>
    %12 = arith.addf %10, %11 : vector<32x128xf32>
    %cst_9 = arith.constant dense<0xFF800000> : vector<128xf32>
    %13 = vector.multi_reduction <maximumf>, %12, %cst_9 [0] : vector<32x128xf32> to vector<128xf32>
    %14 = vector.shape_cast %13 : vector<128xf32> to vector<1x128xf32>
    %15 = vector.broadcast %14 : vector<1x128xf32> to vector<32x128xf32>
    %16 = arith.subf %12, %15 : vector<32x128xf32>
    %17 = math.exp %16 : vector<32x128xf32>
    %18 = arith.truncf %17 : vector<32x128xf32> to vector<32x128xbf16>
    %c0_10 = arith.constant 0 : index
    %c0_11 = arith.constant 0 : index
    %19 = vector.load %arg3[%c0_10, %c0_11] : memref<32x128xbf16, #tpu.memory_space<vmem>>, vector<32x128xbf16>
    tpu.vector_store %arg3[%c0_10, %c0_11], %18 {strides = array<i32>} : memref<32x128xbf16, #tpu.memory_space<vmem>>, vector<32x128xbf16>,
    %20 = arith.mulf %17, %12 : vector<32x128xf32>
    %21 = arith.truncf %20 : vector<32x128xf32> to vector<32x128xbf16>
    %c0_12 = arith.constant 0 : index
    %c0_13 = arith.constant 0 : index
    %22 = vector.load %arg4[%c0_12, %c0_13] : memref<32x128xbf16, #tpu.memory_space<vmem>>, vector<32x128xbf16>
    tpu.vector_store %arg4[%c0_12, %c0_13], %21 {strides = array<i32>} : memref<32x128xbf16, #tpu.memory_space<vmem>>, vector<32x128xbf16>,
    return
  }
}

</mosaic_0001>

<bundles_post_ra>
// kernel: tpu_custom_call.1
= control target key start
LH: loop header
LB: loop body
LE: loop exit
PB: predicated region body
PF: predicated region fallthrough
CT: control target
= control target key end

     0   :  { %11 = vsyncpa [#allocation3], 0  ;;  %s1936_s0 = inlined_call_operand.hbm [shape: f32[32,128], index: 0, kind: input, shape index: {}]   ;;  %s1937_s1 = inlined_call_operand.hbm [shape: f32[128,256], index: 1, kind: input, shape index: {}]   ;;  %s1938_s2 = inlined_call_operand.hbm [shape: f32[1,256], index: 2, kind: input, shape index: {}]   ;;  %s1939_s3 = inlined_call_operand.hbm [shape: bf16[32,128], index: 3, kind: output, shape index: {0}]   ;;  %s1940_s4 = inlined_call_operand.hbm [shape: bf16[32,128], index: 4, kind: output, shape index: {1}]   ;;  %s1941_s5 = inlined_call_operand.hbm [shape: f32[32,128], index: 5, kind: output, shape index: {2}]  }
   0x1   :  { %12 = vsyncpa [#allocation6], 0 }
   0x2   :  { %13 = vsyncpa [#allocation4], 0  ;;  %s32_s20 = sshll.u32 %s1937_s1, 4  ;;  %s33_s20 = int_to_ptr.hbm [resolvable:$true] %s32_s20 }
   0x3   :  { %14 = vsyncpa [#allocation10], 0  ;;  %s1276_s21 = smov [#allocation5]   ;;  %s19_s25 = sshll.u32 %s1936_s0, 4  ;;  %s20_s25 = int_to_ptr.hbm [resolvable:$true] %s19_s25 }
   0x4   :  { %s34_s22 = sshll.u32 %s1276_s21, 4  ;;  %s1277_s26 = smov 256   ;;  %s35_s22 = int_to_ptr.vmem [resolvable:$true] %s34_s22 }
   0x5   :  { %s1278_s27 = smov 16   ;;  %s1279_s28 = smov [#allocation2]  }
   0x6   :  { %40 = dma.hbm_to_vmem [thread:$0]  %s33_s20, 4096, %s35_s22, [#allocation6], %s1277_s26, %s1277_s26, %s1278_s27  }
   0x7   :  { %s21_s29 = sshll.u32 %s1279_s28, 4  ;;  %s1280_s30 = smov 128   ;;  %s22_s29 = int_to_ptr.vmem [resolvable:$true] %s21_s29 }
   0x8   :  { %s1281_s6 = smov 8   ;;  %s46_s8 = sshll.u32 %s1938_s2, 4  ;;  %s47_s8 = int_to_ptr.hbm [resolvable:$true] %s46_s8 }
   0x9   :  { %27 = dma.hbm_to_vmem [thread:$0]  %s20_s25, 512, %s22_s29, [#allocation3], %s1280_s30, %s1280_s30, %s1281_s6  }
   0xa   :  { %s1282_s9 = smov [#allocation7]  }
   0xb   :  { %s48_s0 = sshll.u32 %s1282_s9, 4  ;;  %s49_s0 = int_to_ptr.vmem [resolvable:$true] %s48_s0 }
   0xc   :  { %51 = dma.hbm_to_vmem [thread:$0]  %s47_s8, 32, %s49_s0, [#allocation6]  }
   0xd   :  { %1268 = dma.done.wait [#allocation3], 512  }
   0xe   :  { %1269 = vsyncadd [#allocation3], 4294966784 }
   0xf   :  { %1270 = dma.done.wait [#allocation6], 4128  }
  0x10   :  { %1271 = vsyncadd [#allocation6], 4294963168  ;;  %v98_v0 = vld [vmem:[#allocation5 + $0xf0] sm:$0xff]  ;;  %v96_v1 = vld [vmem:[#allocation5 + $0xe0] sm:$0xff]  ;;  %s1283_s2 = smov [#allocation9]   ;;  %s1046_s13 = sshll.u32 %s1940_s4, 4  ;;  %s1047_s13 = int_to_ptr.hbm [resolvable:$true] %s1046_s13 }
  0x11   :  { %v94_v2 = vld [vmem:[#allocation5 + $0xd0] sm:$0xff]  ;;  %v1330_v3 = vand.u32 4294901760, %v98_v0  ;;  %v1332_v4 = vand.u32 4294901760, %v96_v1  ;;  %v92_v6 = vld [vmem:[#allocation5 + $0xc0] sm:$0xff]  ;;  %s1918_s10 = sshll.u32 %s1283_s2, 4  ;;  %s1284_s14 = smov [#allocation8]   ;;  %s1045_s10 = int_to_ptr.vmem [resolvable:$true] %s1918_s10 }
  0x12   :  { %v1334_v5 = vand.u32 4294901760, %v94_v2  ;;  %v90_v7 = vld [vmem:[#allocation5 + $0xb0] sm:$0xff]  ;;  %v88_v8 = vld [vmem:[#allocation5 + $0xa0] sm:$0xff]  ;;  %v1336_v9 = vand.u32 4294901760, %v92_v6  ;;  %s1031_s15 = sshll.u32 %s1284_s14, 4  ;;  %s1033_s18 = sshll.u32 %s1939_s3, 4  ;;  %s1032_s15 = int_to_ptr.vmem [resolvable:$true] %s1031_s15  ;;  %s1034_s18 = int_to_ptr.hbm [resolvable:$true] %s1033_s18 }
  0x13   :  { %v1338_v10 = vand.u32 4294901760, %v90_v7  ;;  %v1340_v11 = vand.u32 4294901760, %v88_v8  ;;  %v86_v12 = vld [vmem:[#allocation5 + $0x90] sm:$0xff]  ;;  %v84_v13 = vld [vmem:[#allocation5 + $0x80] sm:$0xff]  ;;  %107 = vmatpush.msra.mxu0 %v1330_v3  ;;  %v1344_v14 = vsub.f32 %v98_v0, %v1330_v3  ;;  %v1347_v15 = vsub.f32 %v96_v1, %v1332_v4  ;;  %354 = vmatpush.msra.mxu3 %v1330_v3  ;;  %s1285_s4 = smov [#allocation11]   ;;  %s1059_s22 = sshll.u32 %s1941_s5, 4  ;;  %s1060_s22 = int_to_ptr.hbm [resolvable:$true] %s1059_s22 }
  0x14   :  { %v1351_v16 = vsub.f32 %v94_v2, %v1334_v5  ;;  %v1353_v17 = vand.u32 4294901760, %v86_v12  ;;  %v82_v18 = vld [vmem:[#allocation5 + $0x70] sm:$0xff]  ;;  %v1356_v19 = vsub.f32 %v92_v6, %v1336_v9  ;;  %v1361_v21 = vand.u32 4294901760, %v84_v13  ;;  %v80_v29 = vld [vmem:[#allocation5 + $0x60] sm:$0xff]  ;;  %v99_v6 = vld [vmem:[#allocation5 + $0xf8] sm:$0xff]  ;;  %s1057_s19 = sshll.u32 %s1285_s4, 4  ;;  %s1058_s19 = int_to_ptr.vmem [resolvable:$true] %s1057_s19 }
  0x15   :  { %v1359_v20 = vsub.f32 %v90_v7, %v1338_v10  ;;  %v1364_v22 = vsub.f32 %v88_v8, %v1340_v11  ;;  %109 = vmatpush.msra.mxu0 %v1332_v4  ;;  %286 = vmatpush.msra.mxu2 %v1344_v14  ;;  %v1956_v23 = vand.u32 4294901760, %v1344_v14  ;;  %v1955_v24 = vand.u32 4294901760, %v1347_v15  ;;  %v78_v36 = vld [vmem:[#allocation5 + $0x50] sm:$0xff]  ;;  %v76_v43 = vld [vmem:[#allocation5 + $0x40] sm:$0xff]  ;;  %s1286_s23 = smov 64   ;;  %s1287_s3 = smov 4  }
  0x16   :  { %v1954_v25 = vand.u32 4294901760, %v1351_v16  ;;  %356 = vmatpush.msra.mxu3 %v1332_v4  ;;  %v1952_v26 = vand.u32 4294901760, %v1356_v19  ;;  %v1373_v27 = vand.u32 4294901760, %v82_v18  ;;  %v1376_v28 = vsub.f32 %v86_v12, %v1353_v17  ;;  %v74_v49 = vld [vmem:[#allocation5 + $0x30] sm:$0xff]  ;;  %v72_v55 = vld [vmem:[#allocation5 + $0x20] sm:$0xff] }
  0x17   :  { %111 = vmatpush.msra.mxu0 %v1334_v5  ;;  %289 = vmatpush.msra.mxu2 %v1347_v15  ;;  %v174_v30 = vsub.f32 %v1344_v14, %v1956_v23  ;;  %v180_v31 = vsub.f32 %v1347_v15, %v1955_v24  ;;  %v1950_v33 = vand.u32 4294901760, %v1359_v20  ;;  %v1949_v34 = vand.u32 4294901760, %v1364_v22  ;;  %v64_v56 = vld [vmem:[#allocation2] sm:$0xff]  ;;  %v70_v62 = vld [vmem:[#allocation5 + $0x10] sm:$0xff]  ;;  %v87_v23 = vld [vmem:[#allocation5 + $0x98] sm:$0xff] }
  0x18   :  { %v186_v32 = vsub.f32 %v1351_v16, %v1954_v25  ;;  %358 = vmatpush.msra.mxu3 %v1334_v5  ;;  %v1393_v35 = vsub.f32 %v84_v13, %v1361_v21  ;;  %v192_v39 = vsub.f32 %v1356_v19, %v1952_v26  ;;  %v1400_v40 = vand.u32 4294901760, %v80_v29  ;;  %v68_v12 = vld [vmem:[#allocation5] sm:$0xff] }
  0x19   :  { %113 = vmatpush.msra.mxu0 %v1336_v9  ;;  %v175_v37 = vand.u32 4294901760, %v174_v30  ;;  %292 = vmatpush.msra.mxu2 %v1351_v16  ;;  %v181_v38 = vand.u32 4294901760, %v180_v31  ;;  %v1948_v41 = vand.u32 4294901760, %v1376_v28  ;;  %v1405_v42 = vsub.f32 %v82_v18, %v1373_v27 }
  0x1a   :  { %360 = vmatpush.msra.mxu3 %v1336_v9  ;;  %v187_v44 = vand.u32 4294901760, %v186_v32  ;;  %v198_v45 = vsub.f32 %v1359_v20, %v1950_v33  ;;  %v1411_v46 = vand.u32 4294901760, %v78_v36  ;;  %v204_v47 = vsub.f32 %v1364_v22, %v1949_v34  ;;  %v66_v33 = vld [vmem:[#allocation2 + $0x10] sm:$0xff] }
  0x1b   :  { %115 = vmatpush.msra.mxu0 %v1338_v10  ;;  %176 = vmatpush.msra.mxu1 %v175_v37  ;;  %v1946_v48 = vand.u32 4294901760, %v1393_v35  ;;  %v193_v50 = vand.u32 4294901760, %v192_v39  ;;  %v1420_v51 = vand.u32 4294901760, %v76_v43  ;;  %v1423_v52 = vsub.f32 %v80_v29, %v1400_v40 }
  0x1c   :  { %295 = vmatpush.msra.mxu2 %v1356_v19  ;;  %362 = vmatpush.msra.mxu3 %v1338_v10  ;;  %v210_v53 = vsub.f32 %v1376_v28, %v1948_v41  ;;  %v1945_v54 = vand.u32 4294901760, %v1405_v42  ;;  %v199_v57 = vand.u32 4294901760, %v198_v45  ;;  %v1432_v58 = vand.u32 4294901760, %v74_v49 }
  0x1d   :  { %117 = vmatpush.msra.mxu0 %v1340_v11  ;;  %182 = vmatpush.msra.mxu1 %v181_v38  ;;  %v1435_v59 = vsub.f32 %v78_v36, %v1411_v46  ;;  %v205_v60 = vand.u32 4294901760, %v204_v47  ;;  %v216_v61 = vsub.f32 %v1393_v35, %v1946_v48  ;;  %v1443_v63 = vand.u32 4294901760, %v72_v55  ;;  %v65_v36 = vld [vmem:[#allocation2 + $0x8] sm:$0xff] }
  0x1e   :  { %298 = vmatpush.msra.mxu2 %v1359_v20  ;;  %364 = vmatpush.msra.mxu3 %v1340_v11  ;;  %v1944_v0 = vand.u32 4294901760, %v1423_v52  ;;  %v1447_v1 = vsub.f32 %v76_v43, %v1420_v51  ;;  %v1449_v2 = vand.u32 4294901760, %v64_v56  ;;  %v211_v7 = vand.u32 4294901760, %v210_v53 }
  0x1f   :  { %119 = vmatpush.msra.mxu0 %v1353_v17  ;;  %188 = vmatpush.msra.mxu1 %v187_v44  ;;  %1970 = vst [vmem:[#allocation16_spill] sm:$0xff] %v1443_v63  ;;  %v222_v8 = vsub.f32 %v1405_v42, %v1945_v54  ;;  %v1457_v13 = vand.u32 4294901760, %v70_v62  ;;  %v1942_v18 = vand.u32 4294901760, %v1435_v59  ;;  %v1461_v29 = vsub.f32 %v74_v49, %v1432_v58  ;;  %v97_v44 = vld [vmem:[#allocation5 + $0xe8] sm:$0xff] }
  0x20   :  { %301 = vmatpush.msra.mxu2 %v1364_v22  ;;  %366 = vmatpush.msra.mxu3 %v1353_v17  ;;  %v1464_v30 = vsub.f32 %v64_v56, %v1449_v2  ;;  %v217_v31 = vand.u32 4294901760, %v216_v61  ;;  %v1468_v32 = vand.u32 4294901760, %v99_v6  ;;  %v228_v37 = vsub.f32 %v1423_v52, %v1944_v0  ;;  %v95_v56 = vld [vmem:[#allocation5 + $0xd8] sm:$0xff] }
  0x21   :  { %121 = vmatpush.msra.mxu0 %v1361_v21  ;;  %194 = vmatpush.msra.mxu1 %v193_v50  ;;  %1971 = vst [vmem:[#allocation17_spill] sm:$0xff] %v1457_v13  ;;  %v1474_v38 = vand.u32 4294901760, %v68_v12  ;;  %v1943_v39 = vand.u32 4294901760, %v1447_v1  ;;  %v1478_v43 = vsub.f32 %v72_v55, %v1443_v63  ;;  %v223_v45 = vand.u32 4294901760, %v222_v8 }
  0x22   :  { %304 = vmatpush.msra.mxu2 %v1376_v28  ;;  %368 = vmatpush.msra.mxu3 %v1361_v21  ;;  %1972 = vst [vmem:[#allocation18_spill] sm:$0xff] %v1464_v30  ;;  %v1483_v47 = vand.u32 4294901760, %v1464_v30  ;;  %v234_v49 = vsub.f32 %v1435_v59, %v1942_v18  ;;  %v1947_v50 = vand.u32 4294901760, %v1461_v29  ;;  %v1491_v53 = vsub.f32 %v70_v62, %v1457_v13 }
  0x23   :  { %123 = vmatpush.msra.mxu0 %v1373_v27  ;;  %200 = vmatpush.msra.mxu1 %v199_v57  ;;  %1973 = vst [vmem:[#allocation19_spill] sm:$0xff] %v1474_v38  ;;  %v1493_v55 = vand.u32 4294901760, %v65_v36  ;;  %v1497_v57 = vand.u32 4294901760, %v97_v44  ;;  %v229_v61 = vand.u32 4294901760, %v228_v37  ;;  %v240_v62 = vsub.f32 %v1447_v1, %v1943_v39 }
  0x24   :  { %307 = vmatpush.msra.mxu2 %v1393_v35  ;;  %370 = vmatpush.msra.mxu3 %v1373_v27  ;;  %1974 = vst [vmem:[#allocation20_spill] sm:$0xff] %v1483_v47  ;;  %v1508_v8 = vsub.f32 %v68_v12, %v1474_v38  ;;  %v1514_v18 = vand.u32 4294901760, %v95_v56  ;;  %v235_v37 = vand.u32 4294901760, %v234_v49  ;;  %v246_v39 = vsub.f32 %v1461_v29, %v1947_v50 }
  0x25   :  { %125 = vmatpush.msra.mxu0 %v1400_v40  ;;  %206 = vmatpush.msra.mxu1 %v205_v60  ;;  %v1500_v60 = vsub.f32 %v99_v6, %v1468_v32  ;;  %v141_v6 = vsub.f32 %v1464_v30, %v1483_v47  ;;  %v1953_v12 = vand.u32 4294901760, %v1491_v53  ;;  %v1522_v0 = vsub.f32 %v65_v36, %v1493_v55 }
  0x26   :  { %310 = vmatpush.msra.mxu2 %v1405_v42  ;;  %372 = vmatpush.msra.mxu3 %v1400_v40  ;;  %v1528_v48 = vsub.f32 %v97_v44, %v1497_v57  ;;  %v241_v49 = vand.u32 4294901760, %v240_v62  ;;  %v1958_v36 = vand.u32 4294901760, %v1508_v8  ;;  %v1542_v44 = vsub.f32 %v95_v56, %v1514_v18 }
  0x27   :  { %127 = vmatpush.msra.mxu0 %v1411_v46  ;;  %212 = vmatpush.msra.mxu1 %v211_v7  ;;  %v1951_v7 = vand.u32 4294901760, %v1478_v43  ;;  %1975 = vst [vmem:[#allocation21_spill] sm:$0xff] %v1522_v0  ;;  %v1957_v54 = vand.u32 4294901760, %v1500_v60  ;;  %v1538_v34 = vand.u32 4294901760, %v141_v6  ;;  %v258_v62 = vsub.f32 %v1491_v53, %v1953_v12  ;;  %v89_v6 = vld [vmem:[#allocation5 + $0xa8] sm:$0xff] }
  0x28   :  { %313 = vmatpush.msra.mxu2 %v1423_v52  ;;  %374 = vmatpush.msra.mxu3 %v1411_v46  ;;  %v264_v12 = vsub.f32 %v1508_v8, %v1958_v36  ;;  %v1566_v24 = vand.u32 4294901760, %v66_v33 }
  0x29   :  { %129 = vmatpush.msra.mxu0 %v1420_v51  ;;  %218 = vmatpush.msra.mxu1 %v217_v31  ;;  %v93_v31 = vld [vmem:[#allocation5 + $0xc8] sm:$0xff]  ;;  %v252_v50 = vsub.f32 %v1478_v43, %v1951_v7  ;;  %1977 = vst [vmem:[#allocation23_spill] sm:$0xff] %v1538_v34  ;;  %v1549_v7 = vand.u32 4294901760, %v1522_v0  ;;  %v608_v56 = vsub.f32 %v1500_v60, %v1957_v54  ;;  %v1980_v54 = vand.u32 4294901760, %v1528_v48 }
  0x2a   :  { %316 = vmatpush.msra.mxu2 %v1435_v59  ;;  %376 = vmatpush.msra.mxu3 %v1420_v51  ;;  %v1535_v41 = vand.u32 4294901760, %v93_v31 }
  0x2b   :  { %131 = vmatpush.msra.mxu0 %v1432_v58  ;;  %224 = vmatpush.msra.mxu1 %v223_v45  ;;  %v91_v45 = vld [vmem:[#allocation5 + $0xb8] sm:$0xff]  ;;  %1978 = vst [vmem:[#allocation24_spill] sm:$0xff] %v1549_v7 }
  0x2c   :  { %319 = vmatpush.msra.mxu2 %v1447_v1  ;;  %378 = vmatpush.msra.mxu3 %v1432_v58  ;;  %1976 = vst [vmem:[#allocation22_spill] sm:$0xff] %v1535_v41  ;;  %v1551_v26 = vand.u32 4294901760, %v91_v45  ;;  %v1564_v25 = vsub.f32 %v93_v31, %v1535_v41  ;;  %v149_v31 = vsub.f32 %v1522_v0, %v1549_v7 }
  0x2d   :  { %133 = vmatpush.msra.mxu0 %v1443_v63  ;;  %230 = vmatpush.msra.mxu1 %v229_v61  ;;  %v247_v61 = vand.u32 4294901760, %v246_v39  ;;  %v1571_v39 = vand.u32 4294901760, %v89_v6 }
  0x2e   :  { %322 = vmatpush.msra.mxu2 %v1461_v29  ;;  %380 = vmatpush.msra.mxu3 %v1443_v63  ;;  %v1578_v36 = vsub.f32 %v91_v45, %v1551_v26  ;;  %v1591_v63 = vsub.f32 %v66_v33, %v1566_v24 }
  0x2f   :  { %135 = vmatpush.msra.mxu0 %v1457_v13  ;;  %236 = vmatpush.msra.mxu1 %v235_v37  ;;  %v253_v37 = vand.u32 4294901760, %v252_v50  ;;  %v1979_v50 = vand.u32 4294901760, %v1344_v14  ;;  %v85_v14 = vld [vmem:[#allocation5 + $0x88] sm:$0xff] }
  0x30   :  { %325 = vmatpush.msra.mxu2 %v1478_v43  ;;  %382 = vmatpush.msra.mxu3 %v1457_v13  ;;  %v614_v13 = vsub.f32 %v1528_v48, %v1980_v54  ;;  %v1617_v33 = vand.u32 4294901760, %v1591_v63 }
  0x31   :  { %137 = vmatpush.msra.mxu0 %v1474_v38  ;;  %242 = vmatpush.msra.mxu1 %v241_v49  ;;  %v259_v49 = vand.u32 4294901760, %v258_v62  ;;  %v1981_v62 = vand.u32 4294901760, %v1347_v15  ;;  %v1602_v15 = vand.u32 4294901760, %v149_v31 }
  0x32   :  { %143 = vmatmul.f32.vlgmr.msra.gmra.mxu0 %v1538_v34  ;;  %328 = vmatpush.msra.mxu2 %v1491_v53  ;;  %v609_v34 = vand.u32 4294901760, %v608_v56  ;;  %v1982_v56 = vand.u32 4294901760, %v1542_v44  ;;  %v615_v45 = vand.u32 4294901760, %v614_v13  ;;  %v1988_v13 = vand.u32 4294901760, %v1359_v20  ;;  %v77_v20 = vld [vmem:[#allocation5 + $0x48] sm:$0xff] }
  0x33   :  { %248 = vmatpush.msra.mxu1 %v247_v61  ;;  %413 = vmatpush.msrb.mxu0 %v1979_v50  ;;  %v1585_v61 = vand.u32 4294901760, %v87_v23  ;;  %v265_v50 = vand.u32 4294901760, %v264_v12  ;;  %1983 = vst [vmem:[#allocation25_spill] sm:$0xff] %v1602_v15  ;;  %v1605_v12 = vand.u32 4294901760, %v85_v14 }
  0x34   :  { %331 = vmatpush.msra.mxu2 %v1508_v8  ;;  %384 = vmatpush.msra.mxu3 %v1474_v38  ;;  %v620_v54 = vsub.f32 %v1542_v44, %v1982_v56  ;;  %v1599_v38 = vsub.f32 %v89_v6, %v1571_v39  ;;  %v67_v6 = vld [vmem:[#allocation2 + $0x18] sm:$0xff] }
  0x35   :  { %254 = vmatpush.msra.mxu1 %v253_v37  ;;  %417 = vmatpush.msrb.mxu0 %v1981_v62  ;;  %v83_v37 = vld [vmem:[#allocation5 + $0x78] sm:$0xff]  ;;  %v1984_v62 = vand.u32 4294901760, %v1351_v16  ;;  %v1610_v56 = vsub.f32 %v87_v23, %v1585_v61  ;;  %v81_v16 = vld [vmem:[#allocation5 + $0x68] sm:$0xff] }
  0x36   :  { %334 = vmatmul.f32.vlgmr.msra.gmra.mxu2 %v1464_v30  ;;  %388 = vmatmul.f32.vlgmr.msra.gmra.mxu3 %v1483_v47  ;;  %v1619_v47 = vand.u32 4294901760, %v83_v37  ;;  %v621_v23 = vand.u32 4294901760, %v620_v54  ;;  %v1633_v30 = vand.u32 4294901760, %v67_v6 }
  0x37   :  { %541 = vmatpush.msrb.mxu2 %v1468_v32  ;;  %260 = vmatpush.msra.mxu1 %v259_v49  ;;  %v1985_v49 = vand.u32 4294901760, %v1564_v25 }
  0x38   :  { %421 = vmatpush.msrb.mxu0 %v1984_v62  ;;  %610 = vmatpush.msrb.mxu3 %v609_v34  ;;  %v1986_v34 = vand.u32 4294901760, %v1356_v19  ;;  %v79_v19 = vld [vmem:[#allocation5 + $0x58] sm:$0xff] }
  0x39   :  { %543 = vmatpush.msrb.mxu2 %v1497_v57  ;;  %266 = vmatpush.msra.mxu1 %v265_v50  ;;  %v626_v31 = vsub.f32 %v1564_v25, %v1985_v49  ;;  %v1987_v50 = vand.u32 4294901760, %v1578_v36  ;;  %v1631_v49 = vsub.f32 %v85_v14, %v1605_v12  ;;  %v157_v14 = vsub.f32 %v1591_v63, %v1617_v33 }
  0x3a   :  { %425 = vmatpush.msrb.mxu0 %v1986_v34  ;;  %268 = vmatmul.f32.vlgmr.msra.gmra.mxu1 %v1449_v2  ;;  %v1637_v34 = vand.u32 4294901760, %v81_v16 }
  0x3b   :  { %151 = vmatmul.f32.gmra.mxu0 %v1602_v15  ;;  %492 = vmatpush.msrb.mxu1 %v1330_v3  ;;  %v632_v62 = vsub.f32 %v1578_v36, %v1987_v50  ;;  %v627_v3 = vand.u32 4294901760, %v626_v31  ;;  %v1645_v50 = vsub.f32 %v83_v37, %v1619_v47  ;;  %v1651_v15 = vand.u32 4294901760, %v79_v19 }
  0x3c   :  { %545 = vmatpush.msrb.mxu2 %v1514_v18  ;;  %616 = vmatpush.msrb.mxu3 %v615_v45  ;;  %v1989_v45 = vand.u32 4294901760, %v1599_v38  ;;  %v1658_v37 = vsub.f32 %v67_v6, %v1633_v30  ;;  %v1673_v31 = vand.u32 4294901760, %v77_v20  ;;  %v1994_v6 = vand.u32 4294901760, %v1393_v35 }
  0x3d   :  { %429 = vmatpush.msrb.mxu0 %v1988_v13  ;;  %494 = vmatpush.msrb.mxu1 %v1332_v4  ;;  %v1990_v13 = vand.u32 4294901760, %v1364_v22  ;;  %v633_v4 = vand.u32 4294901760, %v632_v62  ;;  %v75_v22 = vld [vmem:[#allocation5 + $0x38] sm:$0xff]  ;;  %v1992_v62 = vand.u32 4294901760, %v1376_v28  ;;  %v1993_v28 = vand.u32 4294901760, %v1631_v49 }
  0x3e   :  { %547 = vmatpush.msrb.mxu2 %v1535_v41  ;;  %622 = vmatpush.msrb.mxu3 %v621_v23  ;;  %v638_v54 = vsub.f32 %v1599_v38, %v1989_v45  ;;  %v1991_v23 = vand.u32 4294901760, %v1610_v56  ;;  %v1666_v41 = vsub.f32 %v81_v16, %v1637_v34 }
  0x3f   :  { %433 = vmatpush.msrb.mxu0 %v1990_v13  ;;  %339 = vmatmul.f32.gmra.mxu2 %v1522_v0  ;;  %v1670_v13 = vand.u32 4294901760, %v157_v14  ;;  %v650_v16 = vsub.f32 %v1631_v49, %v1993_v28  ;;  %v1687_v14 = vand.u32 4294901760, %v75_v22  ;;  %v1699_v28 = vsub.f32 %v77_v20, %v1673_v31 }
  0x40   :  { %496 = vmatpush.msrb.mxu1 %v1334_v5  ;;  %549 = vmatpush.msrb.mxu2 %v1551_v26  ;;  %v644_v45 = vsub.f32 %v1610_v56, %v1991_v23  ;;  %v639_v5 = vand.u32 4294901760, %v638_v54  ;;  %v1678_v23 = vsub.f32 %v79_v19, %v1651_v15  ;;  %v1995_v54 = vand.u32 4294901760, %v1645_v50  ;;  %v69_v19 = vld [vmem:[#allocation5 + $0x8] sm:$0xff] }
  0x41   :  { %628 = vmatpush.msrb.mxu3 %v627_v3  ;;  %437 = vmatpush.msrb.mxu0 %v1992_v62  ;;  %v1685_v3 = vand.u32 4294901760, %v1658_v37  ;;  %v73_v62 = vld [vmem:[#allocation5 + $0x28] sm:$0xff]  ;;  %v1711_v20 = vsub.f32 %v75_v22, %v1687_v14 }
  0x42   :  { %394 = vmatmul.f32.gmra.mxu3 %v1549_v7  ;;  %498 = vmatpush.msrb.mxu1 %v1336_v9  ;;  %v645_v9 = vand.u32 4294901760, %v644_v45  ;;  %v71_v7 = vld [vmem:[#allocation5 + $0x18] sm:$0xff]  ;;  %v1703_v45 = vand.u32 4294901760, %v73_v62  ;;  %v1999_v22 = vand.u32 4294901760, %v1678_v23 }
  0x43   :  { %551 = vmatpush.msrb.mxu2 %v1571_v39  ;;  %634 = vmatpush.msrb.mxu3 %v633_v4  ;;  %v656_v4 = vsub.f32 %v1645_v50, %v1995_v54  ;;  %v165_v54 = vsub.f32 %v1658_v37, %v1685_v3  ;;  %v1717_v0 = vand.u32 4294901760, %v71_v7 }
  0x44   :  { %441 = vmatpush.msrb.mxu0 %v1994_v6  ;;  %272 = vmatmul.f32.gmra.mxu1 %v1493_v55  ;;  %v1996_v6 = vand.u32 4294901760, %v1405_v42  ;;  %v1998_v42 = vand.u32 4294901760, %v1423_v52  ;;  %v2000_v52 = vand.u32 4294901760, %v1435_v59 }
  0x45   :  { %159 = vmatmul.f32.gmra.mxu0 %v1670_v13  ;;  %500 = vmatpush.msrb.mxu1 %v1338_v10  ;;  %v651_v10 = vand.u32 4294901760, %v650_v16  ;;  %v673_v16 = vand.u32 4294901760, %v1699_v28 }
  0x46   :  { %553 = vmatpush.msrb.mxu2 %v1585_v61  ;;  %640 = vmatpush.msrb.mxu3 %v639_v5  ;;  %v1997_v5 = vand.u32 4294901760, %v1666_v41 }
  0x47   :  { %445 = vmatpush.msrb.mxu0 %v1996_v6  ;;  %502 = vmatpush.msrb.mxu1 %v1340_v11  ;;  %v657_v11 = vand.u32 4294901760, %v656_v4  ;;  %v1729_v6 = vsub.f32 %v73_v62, %v1703_v45  ;;  %v1735_v4 = vand.u32 4294901760, %v165_v54  ;;  %v674_v59 = vsub.f32 %v1699_v28, %v673_v16 }
  0x48   :  { %555 = vmatpush.msrb.mxu2 %v1605_v12  ;;  %646 = vmatpush.msrb.mxu3 %v645_v9  ;;  %v662_v35 = vsub.f32 %v1666_v41, %v1997_v5  ;;  %v668_v9 = vsub.f32 %v1678_v23, %v1999_v22  ;;  %v1731_v5 = vand.u32 4294901760, %v69_v19  ;;  %v1741_v22 = vsub.f32 %v71_v7, %v1717_v0 }
  0x49   :  { %449 = vmatpush.msrb.mxu0 %v1998_v42  ;;  %344 = vmatmul.f32.gmra.mxu2 %v1591_v63  ;;  %v679_v42 = vand.u32 4294901760, %v1711_v20  ;;  %v2001_v62 = vand.u32 4294901760, %v1447_v1  ;;  %v685_v54 = vand.u32 4294901760, %v1729_v6 }
  0x4a   :  { %504 = vmatpush.msrb.mxu1 %v1353_v17  ;;  %557 = vmatpush.msrb.mxu2 %v1619_v47  ;;  %v663_v17 = vand.u32 4294901760, %v662_v35  ;;  %v691_v1 = vand.u32 4294901760, %v1741_v22  ;;  %v2002_v35 = vand.u32 4294901760, %v1461_v29  ;;  %v2004_v29 = vand.u32 4294901760, %v1491_v53  ;;  %v2006_v53 = vld [vmem:[#allocation16_spill] sm:$0xff] }
  0x4b   :  { %652 = vmatpush.msrb.mxu3 %v651_v10  ;;  %453 = vmatpush.msrb.mxu0 %v2000_v52  ;;  %v669_v10 = vand.u32 4294901760, %v668_v9  ;;  %v680_v7 = vsub.f32 %v1711_v20, %v679_v42  ;;  %v2003_v9 = vand.u32 4294901760, %v1478_v43 }
  0x4c   :  { %400 = vmatmul.f32.gmra.mxu3 %v1617_v33  ;;  %506 = vmatpush.msrb.mxu1 %v1361_v21  ;;  %v1752_v21 = vsub.f32 %v69_v19, %v1731_v5  ;;  %v675_v19 = vand.u32 4294901760, %v674_v59 }
  0x4d   :  { %559 = vmatpush.msrb.mxu2 %v1637_v34  ;;  %658 = vmatpush.msrb.mxu3 %v657_v11  ;;  %v681_v52 = vand.u32 4294901760, %v680_v7  ;;  %v2011_v7 = vand.u32 4294901760, %v1528_v48 }
  0x4e   :  { %457 = vmatpush.msrb.mxu0 %v2001_v62  ;;  %276 = vmatmul.f32.gmra.mxu1 %v1566_v24  ;;  %v697_v11 = vand.u32 4294901760, %v1752_v21  ;;  %v2008_v62 = vld [vmem:[#allocation23_spill] sm:$0xff] }
  0x4f   :  { %167 = vmatmul.f32.gmra.mxu0 %v1735_v4  ;;  %508 = vmatpush.msrb.mxu1 %v1373_v27  ;;  %v686_v27 = vsub.f32 %v1729_v6, %v685_v54 }
  0x50   :  { %561 = vmatpush.msrb.mxu2 %v1651_v15  ;;  %664 = vmatpush.msrb.mxu3 %v663_v17  ;;  %v698_v17 = vsub.f32 %v1752_v21, %v697_v11 }
  0x51   :  { %461 = vmatpush.msrb.mxu0 %v2002_v35  ;;  %510 = vmatpush.msrb.mxu1 %v1400_v40  ;;  %v692_v40 = vsub.f32 %v1741_v22, %v691_v1  ;;  %v687_v43 = vand.u32 4294901760, %v686_v27  ;;  %v2014_v35 = vld [vmem:[#allocation25_spill] sm:$0xff] }
  0x52   :  { %563 = vmatpush.msrb.mxu2 %v1673_v31  ;;  %670 = vmatpush.msrb.mxu3 %v669_v10  ;;  %v2010_v10 = vld [vmem:[#allocation19_spill] sm:$0xff] }
  0x53   :  { %465 = vmatpush.msrb.mxu0 %v2003_v9  ;;  %349 = vmatmul.f32.gmra.mxu2 %v1658_v37  ;;  %v693_v59 = vand.u32 4294901760, %v692_v40 }
  0x54   :  { %512 = vmatpush.msrb.mxu1 %v1411_v46  ;;  %565 = vmatpush.msrb.mxu2 %v1687_v14  ;;  %v2005_v46 = vand.u32 4294901760, %v1508_v8  ;;  %v2007_v8 = vld [vmem:[#allocation17_spill] sm:$0xff] }
  0x55   :  { %676 = vmatpush.msrb.mxu3 %v675_v19  ;;  %469 = vmatpush.msrb.mxu0 %v2004_v29 }
  0x56   :  { %406 = vmatmul.f32.gmra.mxu3 %v1685_v3  ;;  %514 = vmatpush.msrb.mxu1 %v1420_v51  ;;  %v699_v51 = vand.u32 4294901760, %v698_v17 }
  0x57   :  { %567 = vmatpush.msrb.mxu2 %v1703_v45  ;;  %682 = vmatpush.msrb.mxu3 %v681_v52 }
  0x58   :  { %473 = vmatpush.msrb.mxu0 %v2005_v46  ;;  %280 = vmatmul.f32.gmra.mxu1 %v1633_v30 }
  0x59   :  { %475 = vmatmul.f32.vlgmr.msrb.gmra.mxu0 %v1449_v2  ;;  %516 = vmatpush.msrb.mxu1 %v1432_v58  ;;  %v2009_v58 = vand.u32 4294901760, %v1500_v60 }
  0x5a   :  { %569 = vmatpush.msrb.mxu2 %v1717_v0  ;;  %688 = vmatpush.msrb.mxu3 %v687_v43 }
  0x5b   :  { %720 = vmatpush.msra.mxu0 %v1500_v60  ;;  %518 = vmatpush.msrb.mxu1 %v2006_v53  ;;  %v2012_v60 = vand.u32 4294901760, %v1542_v44 }
  0x5c   :  { %571 = vmatpush.msrb.mxu2 %v1731_v5  ;;  %694 = vmatpush.msrb.mxu3 %v693_v59 }
  0x5d   :  { %723 = vmatpush.msra.mxu0 %v1528_v48  ;;  %520 = vmatpush.msrb.mxu1 %v2007_v8  ;;  %v2013_v48 = vand.u32 4294901760, %v1564_v25 }
  0x5e   :  { %577 = vmatmul.f32.vlgmr.msrb.gmra.mxu2 %v2008_v62  ;;  %700 = vmatpush.msrb.mxu3 %v699_v51 }
  0x5f   :  { %847 = vmatpush.msra.mxu2 %v2009_v58  ;;  %726 = vmatpush.msra.mxu0 %v1542_v44  ;;  %v2016_v44 = vld [vmem:[#allocation22_spill] sm:$0xff] }
  0x60   :  { %522 = vmatpush.msrb.mxu1 %v2010_v10  ;;  %702 = vmatmul.f32.vlgmr.msrb.gmra.mxu3 %v1449_v2 }
  0x61   :  { %851 = vmatpush.msra.mxu2 %v2011_v7  ;;  %926 = vmatpush.msra.mxu3 %v1468_v32 }
  0x62   :  { %729 = vmatpush.msra.mxu0 %v1564_v25  ;;  %524 = vmatmul.f32.vlgmr.msrb.gmra.mxu1 %v1449_v2  ;;  %v2017_v25 = vand.u32 4294901760, %v1599_v38 }
  0x63   :  { %479 = vmatmul.f32.gmra.mxu0 %v1493_v55  ;;  %788 = vmatpush.msra.mxu1 %v1468_v32  ;;  %v2015_v32 = vand.u32 4294901760, %v1578_v36 }
  0x64   :  { %855 = vmatpush.msra.mxu2 %v2012_v60  ;;  %928 = vmatpush.msra.mxu3 %v1497_v57 }
  0x65   :  { %732 = vmatpush.msra.mxu0 %v1578_v36  ;;  %790 = vmatpush.msra.mxu1 %v1497_v57  ;;  %v2021_v57 = vand.u32 4294901760, %v1666_v41  ;;  %v2022_v36 = vand.u32 4294901760, %v1678_v23 }
  0x66   :  { %859 = vmatpush.msra.mxu2 %v2013_v48  ;;  %930 = vmatpush.msra.mxu3 %v1514_v18 }
  0x67   :  { %735 = vmatpush.msra.mxu0 %v1599_v38  ;;  %585 = vmatmul.f32.gmra.mxu2 %v2014_v35  ;;  %v2019_v38 = vand.u32 4294901760, %v1631_v49 }
  0x68   :  { %792 = vmatpush.msra.mxu1 %v1514_v18  ;;  %863 = vmatpush.msra.mxu2 %v2015_v32  ;;  %v2018_v18 = vand.u32 4294901760, %v1610_v56 }
  0x69   :  { %932 = vmatpush.msra.mxu3 %v2016_v44  ;;  %738 = vmatpush.msra.mxu0 %v1610_v56 }
  0x6a   :  { %706 = vmatmul.f32.gmra.mxu3 %v1493_v55  ;;  %794 = vmatpush.msra.mxu1 %v2016_v44 }
  0x6b   :  { %867 = vmatpush.msra.mxu2 %v2017_v25  ;;  %934 = vmatpush.msra.mxu3 %v1551_v26 }
  0x6c   :  { %741 = vmatpush.msra.mxu0 %v1631_v49  ;;  %528 = vmatmul.f32.gmra.mxu1 %v1493_v55 }
  0x6d   :  { %483 = vmatmul.f32.gmra.mxu0 %v1566_v24  ;;  %796 = vmatpush.msra.mxu1 %v1551_v26  ;;  %v2020_v26 = vand.u32 4294901760, %v1645_v50 }
  0x6e   :  { %871 = vmatpush.msra.mxu2 %v2018_v18  ;;  %936 = vmatpush.msra.mxu3 %v1571_v39 }
  0x6f   :  { %744 = vmatpush.msra.mxu0 %v1645_v50  ;;  %798 = vmatpush.msra.mxu1 %v1571_v39  ;;  %v2025_v39 = vld [vmem:[#allocation21_spill] sm:$0xff] }
  0x70   :  { %875 = vmatpush.msra.mxu2 %v2019_v38  ;;  %938 = vmatpush.msra.mxu3 %v1585_v61 }
  0x71   :  { %747 = vmatpush.msra.mxu0 %v1666_v41  ;;  %593 = vmatmul.f32.gmra.mxu2 %v1670_v13  ;;  %v2023_v41 = vld [vmem:[#allocation18_spill] sm:$0xff] }
  0x72   :  { %800 = vmatpush.msra.mxu1 %v1585_v61  ;;  %879 = vmatpush.msra.mxu2 %v2020_v26  ;;  %v2026_v61 = vld [vmem:[#allocation24_spill] sm:$0xff] }
  0x73   :  { %940 = vmatpush.msra.mxu3 %v1605_v12  ;;  %750 = vmatpush.msra.mxu0 %v1678_v23 }
  0x74   :  { %710 = vmatmul.f32.gmra.mxu3 %v1566_v24  ;;  %802 = vmatpush.msra.mxu1 %v1605_v12 }
  0x75   :  { %883 = vmatpush.msra.mxu2 %v2021_v57  ;;  %942 = vmatpush.msra.mxu3 %v1619_v47 }
  0x76   :  { %753 = vmatpush.msra.mxu0 %v1699_v28  ;;  %532 = vmatmul.f32.gmra.mxu1 %v1566_v24 }
  0x77   :  { %487 = vmatmul.f32.gmra.mxu0 %v1633_v30  ;;  %804 = vmatpush.msra.mxu1 %v1619_v47  ;;  %v2024_v47 = vld [vmem:[#allocation20_spill] sm:$0xff] }
  0x78   :  { %887 = vmatpush.msra.mxu2 %v2022_v36  ;;  %944 = vmatpush.msra.mxu3 %v1637_v34 }
  0x79   :  { %756 = vmatpush.msra.mxu0 %v1711_v20  ;;  %806 = vmatpush.msra.mxu1 %v1637_v34 }
  0x7a   :  { %891 = vmatpush.msra.mxu2 %v673_v16  ;;  %946 = vmatpush.msra.mxu3 %v1651_v15 }
  0x7b   :  { %759 = vmatpush.msra.mxu0 %v1729_v6  ;;  %601 = vmatmul.f32.gmra.mxu2 %v1735_v4 }
  0x7c   :  { %808 = vmatpush.msra.mxu1 %v1651_v15  ;;  %895 = vmatpush.msra.mxu2 %v679_v42 }
  0x7d   :  { %948 = vmatpush.msra.mxu3 %v1673_v31  ;;  %762 = vmatpush.msra.mxu0 %v1741_v22 }
  0x7e   :  { %714 = vmatmul.f32.gmra.mxu3 %v1633_v30  ;;  %810 = vmatpush.msra.mxu1 %v1673_v31 }
  0x7f   :  { %899 = vmatpush.msra.mxu2 %v685_v54  ;;  %950 = vmatpush.msra.mxu3 %v1687_v14 }
  0x80   :  { %765 = vmatpush.msra.mxu0 %v1752_v21  ;;  %536 = vmatmul.f32.gmra.mxu1 %v1633_v30 }
  0x81   :  { %768 = vmatmul.f32.vlgmr.msra.gmra.mxu0 %v2023_v41  ;;  %812 = vmatpush.msra.mxu1 %v1687_v14 }
  0x82   :  { %903 = vmatpush.msra.mxu2 %v691_v1  ;;  %952 = vmatpush.msra.mxu3 %v1703_v45 }
  0x83   :  { %814 = vmatpush.msra.mxu1 %v1703_v45  ;;  %v100_v45 = vld [vmem:[#allocation7] sm:$0x3] }
  0x84   :  { %907 = vmatpush.msra.mxu2 %v697_v11  ;;  %954 = vmatpush.msra.mxu3 %v1717_v0  ;;  %v102_v16 = vperm.slane %v100_v45, 0  ;;  %v103_v32 = vperm.slane %v100_v45, 1 }
  0x85   :  { %816 = vmatpush.msra.mxu1 %v1717_v0  ;;  %909 = vmatmul.f32.vlgmr.msra.gmra.mxu2 %v1449_v2 }
  0x86   :  { %956 = vmatpush.msra.mxu3 %v1731_v5 }
  0x87   :  { %818 = vmatpush.msra.mxu1 %v1731_v5  ;;  %958 = vmatmul.f32.vlgmr.msra.gmra.mxu3 %v1449_v2 }
  0x88   :  { %822 = vmatmul.f32.vlgmr.msra.gmra.mxu1 %v2024_v47 }
  0x89   :  { %773 = vmatmul.f32.gmra.mxu0 %v2025_v39 }
  0x8d   :  { %913 = vmatmul.f32.gmra.mxu2 %v1493_v55 }
  0x8f   :  { %962 = vmatmul.f32.gmra.mxu3 %v1493_v55 }
  0x90   :  { %828 = vmatmul.f32.gmra.mxu1 %v2026_v61 }
  0x91   :  { %778 = vmatmul.f32.gmra.mxu0 %v1591_v63 }
  0x95   :  { %917 = vmatmul.f32.gmra.mxu2 %v1566_v24 }
  0x97   :  { %966 = vmatmul.f32.gmra.mxu3 %v1566_v24 }
  0x98   :  { %834 = vmatmul.f32.gmra.mxu1 %v1617_v33 }
  0x99   :  { %783 = vmatmul.f32.gmra.mxu0 %v1658_v37 }
  0x9d   :  { %921 = vmatmul.f32.gmra.mxu2 %v1633_v30 }
  0x9f   :  { %970 = vmatmul.f32.gmra.mxu3 %v1633_v30 }
  0xa0   :  { %840 = vmatmul.f32.gmra.mxu1 %v1685_v3 }
  0xaf   :  { %v144_v0 = vpop.f32.mrf.mxu0 }
  0xb0   :  { %v145_v4 = vadd.f32 %v144_v0, %v102_v16 }
  0xb7   :  { %v269_v2 = vpop.f32.mrf.mxu1 }
  0xb8   :  { %v152_v55 = vpop.f32.mrf.mxu0  ;;  %v270_v19 = vadd.f32 %v269_v2, %v145_v4 }
  0xb9   :  { %v335_v15 = vpop.f32.mrf.mxu2  ;;  %v389_v12 = vpop.f32.mrf.mxu3  ;;  %v153_v6 = vadd.f32 %v152_v55, %v102_v16 }
  0xba   :  { %v336_v52 = vadd.f32 %v335_v15, %v270_v19 }
  0xbc   :  { %v390_v51 = vadd.f32 %v389_v12, %v336_v52 }
  0xc1   :  { %v273_v63 = vpop.f32.mrf.mxu1 }
  0xc2   :  { %v160_v56 = vpop.f32.mrf.mxu0  ;;  %v340_v49 = vpop.f32.mrf.mxu2  ;;  %v274_v21 = vadd.f32 %v273_v63, %v153_v6 }
  0xc3   :  { %v161_v42 = vadd.f32 %v160_v56, %v102_v16 }
  0xc4   :  { %v341_v9 = vadd.f32 %v340_v49, %v274_v21 }
  0xc5   :  { %v395_v34 = vpop.f32.mrf.mxu3 }
  0xc6   :  { %v396_v17 = vadd.f32 %v395_v34, %v341_v9 }
  0xcb   :  { %v277_v24 = vpop.f32.mrf.mxu1 }
  0xcc   :  { %v168_v50 = vpop.f32.mrf.mxu0  ;;  %v345_v33 = vpop.f32.mrf.mxu2  ;;  %v278_v11 = vadd.f32 %v277_v24, %v161_v42 }
  0xcd   :  { %v169_v27 = vadd.f32 %v168_v50, %v102_v16 }
  0xce   :  { %v346_v40 = vadd.f32 %v345_v33, %v278_v11 }
  0xcf   :  { %v401_v31 = vpop.f32.mrf.mxu3 }
  0xd0   :  { %v402_v53 = vadd.f32 %v401_v31, %v346_v40 }
  0xd5   :  { %v281_v37 = vpop.f32.mrf.mxu1 }
  0xd6   :  { %v476_v13 = vpop.f32.mrf.mxu0  ;;  %v350_v23 = vpop.f32.mrf.mxu2  ;;  %v282_v29 = vadd.f32 %v281_v37, %v169_v27 }
  0xd7   :  { %v477_v10 = vadd.f32 %v476_v13, %v390_v51 }
  0xd8   :  { %v351_v8 = vadd.f32 %v350_v23, %v282_v29 }
  0xd9   :  { %v407_v14 = vpop.f32.mrf.mxu3 }
  0xda   :  { %v408_v48 = vadd.f32 %v407_v14, %v351_v8 }
  0xdf   :  { %v525_v30 = vpop.f32.mrf.mxu1 }
  0xe0   :  { %v480_v28 = vpop.f32.mrf.mxu0  ;;  %v526_v35 = vadd.f32 %v525_v30, %v477_v10 }
  0xe1   :  { %v578_v3 = vpop.f32.mrf.mxu2  ;;  %v481_v62 = vadd.f32 %v480_v28, %v396_v17 }
  0xe2   :  { %v978_v26 = vmax.f32 %v526_v35, 0.0  ;;  %v579_v57 = vadd.f32 %v578_v3, %v103_v32 }
  0xe3   :  { %v703_v20 = vpop.f32.mrf.mxu3 }
  0xe4   :  { %v1908_v55 = vadd.f32 1e-07, %v978_v26  ;;  %v704_v15 = vadd.f32 %v703_v20, %v579_v57 }
  0xe9   :  { %v529_v5 = vpop.f32.mrf.mxu1 }
  0xea   :  { %v484_v22 = vpop.f32.mrf.mxu0  ;;  %v586_v54 = vpop.f32.mrf.mxu2  ;;  %v530_v60 = vadd.f32 %v529_v5, %v481_v62 }
  0xeb   :  { %v485_v7 = vadd.f32 %v484_v22, %v402_v53  ;;  %v587_v50 = vadd.f32 %v586_v54, %v103_v32 }
  0xec   :  { %v979_v25 = vmax.f32 %v530_v60, 0.0 }
  0xed   :  { %v707_v1 = vpop.f32.mrf.mxu3 }
  0xee   :  { %v1906_v61 = vadd.f32 1e-07, %v979_v25  ;;  %v708_v30 = vadd.f32 %v707_v1, %v587_v50 }
  0xf0   :  { %v986_v56 = vmax.f32 %v1908_v55, %v1906_v61 }
  0xf3   :  { %v533_v43 = vpop.f32.mrf.mxu1 }
  0xf4   :  { %v488_v46 = vpop.f32.mrf.mxu0  ;;  %v594_v59 = vpop.f32.mrf.mxu2  ;;  %v534_v44 = vadd.f32 %v533_v43, %v485_v7 }
  0xf5   :  { %v489_v18 = vadd.f32 %v488_v46, %v408_v48  ;;  %v595_v6 = vadd.f32 %v594_v59, %v103_v32 }
  0xf6   :  { %v980_v36 = vmax.f32 %v534_v44, 0.0 }
  0xf7   :  { %v711_v58 = vpop.f32.mrf.mxu3 }
  0xf8   :  { %v984_v12 = vadd.f32 1e-07, %v980_v36  ;;  %v712_v19 = vadd.f32 %v711_v58, %v595_v6 }
  0xfd   :  { %v537_v38 = vpop.f32.mrf.mxu1 }
  0xfe   :  { %v538_v41 = vadd.f32 %v537_v38, %v489_v18  ;;  %v769_v47 = vpop.f32.mrf.mxu0  ;;  %v602_v39 = vpop.f32.mrf.mxu2 }
  0xff   :  { %v770_v34 = vadd.f32 %v769_v47, %v704_v15  ;;  %v603_v53 = vadd.f32 %v602_v39, %v103_v32 }
 0x100   :  { %v981_v0 = vmax.f32 %v538_v41, 0.0 }
 0x101   :  { %v715_v2 = vpop.f32.mrf.mxu3 }
 0x102   :  { %v1910_v63 = vadd.f32 1e-07, %v981_v0  ;;  %v716_v48 = vadd.f32 %v715_v2, %v603_v53 }
 0x104   :  { %v987_v49 = vmax.f32 %v984_v12, %v1910_v63 }
 0x105   :  { %v823_v24 = vpop.f32.mrf.mxu1 }
 0x106   :  { %v988_v33 = vmax.f32 %v986_v56, %v987_v49  ;;  %v774_v31 = vpop.f32.mrf.mxu0  ;;  %v824_v37 = vadd.f32 %v823_v24, %v770_v34 }
 0x107   :  { %v775_v16 = vadd.f32 %v774_v31, %v708_v30 }
 0x108   :  { %v989_v13 = vrot.slane %v988_v33, 4  ;;  %v910_v23 = vpop.f32.mrf.mxu2 }
 0x109   :  { %v911_v14 = vadd.f32 %v910_v23, %v824_v37 }
 0x10a   :  { %v990_v28 = vmax.f32 %v988_v33, %v989_v13  ;;  %v959_v3 = vpop.f32.mrf.mxu3 }
 0x10b   :  { %v960_v45 = vadd.f32 %v959_v3, %v911_v14 }
 0x10c   :  { %v991_v20 = vrot.slane %v990_v28, 2 }
 0x10d   :  { %974 = vst [vmem:[#allocation11] sm:$0xff] %v960_v45  ;;  %v829_v5 = vpop.f32.mrf.mxu1 }
 0x10e   :  { %v992_v4 = vmax.f32 %v990_v28, %v991_v20  ;;  %v830_v42 = vadd.f32 %v829_v5, %v775_v16  ;;  %v779_v22 = vpop.f32.mrf.mxu0 }
 0x10f   :  { %v780_v52 = vadd.f32 %v779_v22, %v712_v19 }
 0x110   :  { %v993_v21 = vrot.slane %v992_v4, 1  ;;  %v914_v54 = vpop.f32.mrf.mxu2 }
 0x111   :  { %v915_v27 = vadd.f32 %v914_v54, %v830_v42 }
 0x112   :  { %v994_v11 = vmax.f32 %v992_v4, %v993_v21  ;;  %v963_v9 = vpop.f32.mrf.mxu3 }
 0x113   :  { %v964_v40 = vadd.f32 %v963_v9, %v915_v27 }
 0x114   :  { %v995_v1 = vsub.f32 %v1908_v55, %v994_v11  ;;  %v996_v29 = vsub.f32 %v1906_v61, %v994_v11  ;;  %v997_v43 = vsub.f32 %v984_v12, %v994_v11  ;;  %v998_v17 = vsub.f32 %v1910_v63, %v994_v11 }
 0x115   :  { %975 = vst [vmem:[#allocation11 + $0x8] sm:$0xff] %v964_v40  ;;  %v835_v46 = vpop.f32.mrf.mxu1 }
 0x116   :  { %v999_v59 = vmul.f32 1.442695, %v995_v1  ;;  %v1003_v51 = vmul.f32 1.442695, %v997_v43  ;;  %v836_v8 = vadd.f32 %v835_v46, %v780_v52  ;;  %v1001_v62 = vmul.f32 1.442695, %v996_v29  ;;  %v784_v7 = vpop.f32.mrf.mxu0 }
 0x117   :  { %v1005_v58 = vmul.f32 1.442695, %v998_v17  ;;  %v785_v25 = vadd.f32 %v784_v7, %v716_v48 }
 0x118   :  { %1116 = vpow2.f32 %v1003_v51  ;;  %v918_v10 = vpop.f32.mrf.mxu2 }
 0x119   :  { %1118 = vpow2.f32 %v1005_v58  ;;  %v919_v60 = vadd.f32 %v918_v10, %v836_v8 }
 0x11a   :  { %v967_v35 = vpop.f32.mrf.mxu3  ;;  %1120 = vpow2.f32 %v999_v59 }
 0x11b   :  { %v968_v44 = vadd.f32 %v967_v35, %v919_v60  ;;  %1122 = vpow2.f32 %v1001_v62 }
 0x11d   :  { %976 = vst [vmem:[#allocation11 + $0x10] sm:$0xff] %v968_v44  ;;  %v841_v18 = vpop.f32.mrf.mxu1 }
 0x11e   :  { %v1117_v38 = vpop.eup %1116  ;;  %v842_v26 = vadd.f32 %v841_v18, %v785_v25 }
 0x11f   :  { %v1119_v57 = vpop.eup %1118  ;;  %v1017_v32 = vmul.f32 %v1117_v38, %v984_v12 }
 0x120   :  { %v1121_v36 = vpop.eup %1120  ;;  %v1018_v41 = vmul.f32 %v1119_v57, %v1910_v63  ;;  %v922_v47 = vpop.f32.mrf.mxu2  ;;  %v1090_v39 = vpack.c.bf16 %v1119_v57, %v1117_v38 }
 0x121   :  { %v1123_v0 = vpop.eup %1122  ;;  %v923_v2 = vadd.f32 %v922_v47, %v842_v26  ;;  %v1015_v15 = vmul.f32 %v1121_v36, %v1908_v55 }
 0x122   :  { %v1100_v56 = vpack.c.bf16 %v1018_v41, %v1017_v32  ;;  %v971_v49 = vpop.f32.mrf.mxu3  ;;  %v1016_v12 = vmul.f32 %v1123_v0, %v1906_v61  ;;  %1102 = vst [vmem:[#allocation8 + $0x8] sm:$0xff] %v1090_v39   ;;  %v1085_v34 = vpack.c.bf16 %v1123_v0, %v1121_v36 }
 0x123   :  { %v972_v63 = vadd.f32 %v971_v49, %v923_v2 }
 0x124   :  { %1103 = vst [vmem:[#allocation9 + $0x8] sm:$0xff] %v1100_v56   ;;  %v1095_v55 = vpack.c.bf16 %v1016_v12, %v1015_v15 }
 0x125   :  { %977 = vst [vmem:[#allocation11 + $0x18] sm:$0xff] %v972_v63 }
 0x126   :  { %1096 = vst [vmem:[#allocation9] sm:$0xff] %v1095_v55  }
 0x127   :  { %1052 = dma.vmem_to_hbm [thread:$0]  %s1045_s10, 256, %s1047_s13, [#allocation10], %s1286_s23, %s1286_s23, %s1287_s3   ;;  %1086 = vst [vmem:[#allocation8] sm:$0xff] %v1085_v34  }
 0x128   :  { %1039 = dma.vmem_to_hbm [thread:$0]  %s1032_s15, 256, %s1034_s18, [#allocation4], %s1286_s23, %s1286_s23, %s1287_s3  }
 0x129   :  { %1065 = dma.vmem_to_hbm [thread:$0]  %s1058_s19, 512, %s1060_s22, [#allocation10], %s1280_s30, %s1280_s30, %s1281_s6  }
 0x12a   :  { %1272 = dma.done.wait [#allocation4], 256  }
 0x12b   :  { %1273 = vsyncadd [#allocation4], 4294967040 }
 0x12c   :  { %1274 = dma.done.wait [#allocation10], 768  }
 0x12d   :  { %1275 = vsyncadd [#allocation10], 4294966528 }
 0x12e   :  { %1078 = vsyncpa [#allocation3], 1 }
 0x12f   :  { %1079 = vsyncpa [#allocation6], 1 }
 0x130   :  { %1080 = vsyncpa [#allocation4], 1 }
 0x131   :  { %1081 = vsyncpa [#allocation10], 1 }

</bundles_post_ra>
